<compile_context>
chip_gen: v6e
topology: v6e:2x2x1
jax: 0.10.0
libtpu: 0.0.40
codegen_flags: <defaults>
</compile_context>

<pallas_src>
import jax
import jax.numpy as jnp
from jax.experimental import pallas as pl
from jax.experimental.pallas import tpu as pltpu

# ----- synthetic config ------------------------------------------------------
B = 2      # batch
T = 16     # max_sen_len
D = 32     # word_vec_dim
K = 3      # conv_kernel_size
PAD = K // 2
H = 32     # hidden_size
C = 10     # num_category
V = 100    # num_embeddings


# ----- single fused kernel ----------------------------------------------------
def fused_kernel(tok_ref, emb_ref, wconv_ref, bconv_ref,
                 w1a_ref, w1b_ref, b1_ref, w2_ref, b2_ref,
                 o_ref, xpad_ref):
    # tok_ref : (B*T, 1) int32       token ids
    # emb_ref : (V, D)               embedding table (padding row 0 is zeroed)
    # wconv_ref: (K, D_in, D_out)    wconv[k] = torch_conv_w[:, :, k].T
    # bconv_ref: (1, D)
    # w1a_ref / w1b_ref: (D, H)      l1 weight split (conv half / raw-emb half)
    # b1_ref  : (1, H);  w2_ref: (H, C);  b2_ref: (1, C)
    # o_ref   : (B, C)
    # xpad_ref: (B, T + 2*PAD, D)    VMEM scratch for "same" padding

    # ---- embedding gather: one-hot x table on the MXU (table stays in VMEM) ----
    tok = tok_ref[...]                                              # (B*T, 1)
    lane_ids = jax.lax.broadcasted_iota(jnp.int32, (B * T, V), 1)   # (B*T, V)
    onehot = (tok == lane_ids).astype(jnp.float32)                  # (B*T, V)
    emb = jnp.dot(onehot, emb_ref[...],
                  preferred_element_type=jnp.float32)               # (B*T, D)
    emb_btd = emb.reshape(B, T, D)

    # ---- Conv1d "same": padding folded in-kernel, K static taps on the MXU ----
    xpad_ref[...] = jnp.zeros((B, T + 2 * PAD, D), jnp.float32)
    xpad_ref[:, PAD:PAD + T, :] = emb_btd
    acc = jnp.zeros((B * T, D), jnp.float32)
    for k in range(K):                                              # static unroll
        tap = xpad_ref[:, k:k + T, :].reshape(B * T, D)
        acc = acc + jnp.dot(tap, wconv_ref[k],
                            preferred_element_type=jnp.float32)
    conv_btd = (acc + bconv_ref[...]).reshape(B, T, D)
    # dropout: identity in eval mode.

    # ---- mlp_layer: ReLU -> max over seq -> split l1 (no concat) -> ReLU -> l2 ----
    f1 = jnp.max(jnp.maximum(conv_btd, 0.0), axis=1)                # (B, D)
    f2 = jnp.max(jnp.maximum(emb_btd, 0.0), axis=1)                 # (B, D)
    h = (jnp.dot(f1, w1a_ref[...], preferred_element_type=jnp.float32)
         + jnp.dot(f2, w1b_ref[...], preferred_element_type=jnp.float32)
         + b1_ref[...])
    h = jnp.maximum(h, 0.0)
    o_ref[...] = (jnp.dot(h, w2_ref[...], preferred_element_type=jnp.float32)
                  + b2_ref[...])


# ----- one-time parameter packing (hoisted out of the forward path) -----------
def pack_params(params):
    return {
        "emb":   params["embedding"].astype(jnp.float32),                         # (V, D)
        "wconv": jnp.transpose(params["conv_w"], (2, 1, 0)).astype(jnp.float32),  # (K, D, D)
        "bconv": params["conv_b"].reshape(1, D).astype(jnp.float32),
        "w1a":   jnp.transpose(params["l1_w"][:, :D]).astype(jnp.float32),        # (D, H)
        "w1b":   jnp.transpose(params["l1_w"][:, D:]).astype(jnp.float32),        # (D, H)
        "b1":    params["l1_b"].reshape(1, H).astype(jnp.float32),
        "w2t":   jnp.transpose(params["l2_w"]).astype(jnp.float32),               # (H, C)
        "b2":    params["l2_b"].reshape(1, C).astype(jnp.float32),
    }


# ----- full forward: one pallas_call ------------------------------------------
@jax.jit
def hybrid_forward(tokens, packed):
    # tokens: (B, T) int32
    tok2d = tokens.reshape(B * T, 1).astype(jnp.int32)   # trivial metadata reshape
    full2d = lambda shape: pl.BlockSpec(shape, lambda i: (0, 0))
    return pl.pallas_call(
        fused_kernel,
        out_shape=jax.ShapeDtypeStruct((B, C), jnp.float32),
        grid=(1,),
        in_specs=[
            full2d((B * T, 1)),                              # tokens
            full2d((V, D)),                                  # embedding table
            pl.BlockSpec((K, D, D), lambda i: (0, 0, 0)),    # conv weight (per tap)
            full2d((1, D)),                                  # conv bias
            full2d((D, H)),                                  # l1 weight, conv half
            full2d((D, H)),                                  # l1 weight, raw-emb half
            full2d((1, H)),                                  # l1 bias
            full2d((H, C)),                                  # l2 weight
            full2d((1, C)),                                  # l2 bias
        ],
        out_specs=full2d((B, C)),
        scratch_shapes=[pltpu.VMEM((B, T + 2 * PAD, D), jnp.float32)],
        compiler_params=pltpu.CompilerParams(
            dimension_semantics=("arbitrary",)),             # single step; no megacore split
    )(tok2d, packed["emb"], packed["wconv"], packed["bconv"],
      packed["w1a"], packed["w1b"], packed["b1"], packed["w2t"], packed["b2"])


# ----- pure-JAX reference for sanity ------------------------------------------
def reference_forward(tokens, params):
    emb = jnp.take(params["embedding"], tokens, axis=0)
    xp = jnp.pad(emb, ((0, 0), (PAD, PAD), (0, 0)))
    conv = sum(jnp.einsum("btc,oc->bto", xp[:, k:k + T, :],
                          params["conv_w"][:, :, k]) for k in range(K))
    conv = conv + params["conv_b"][None, None, :]
    f1 = jnp.max(jax.nn.relu(conv), axis=1)
    f2 = jnp.max(jax.nn.relu(emb), axis=1)
    x = jnp.concatenate([f1, f2], axis=1)
    h = jax.nn.relu(x @ params["l1_w"].T + params["l1_b"])
    return h @ params["l2_w"].T + params["l2_b"]


if __name__ == "__main__":
    key = jax.random.PRNGKey(0)
    ks = jax.random.split(key, 8)

    embedding = 0.1 * jax.random.normal(ks[0], (V, D), jnp.float32)
    embedding = embedding.at[0].set(0.0)                       # padding_idx=0
    params = {
        "embedding": embedding,
        "conv_w": 0.1 * jax.random.normal(ks[1], (D, D, K), jnp.float32),
        "conv_b": 0.1 * jax.random.normal(ks[2], (D,), jnp.float32),
        "l1_w": 0.1 * jax.random.normal(ks[3], (H, 2 * D), jnp.float32),
        "l1_b": 0.1 * jax.random.normal(ks[4], (H,), jnp.float32),
        "l2_w": 0.1 * jax.random.normal(ks[5], (C, H), jnp.float32),
        "l2_b": 0.1 * jax.random.normal(ks[6], (C,), jnp.float32),
    }
    tokens = jax.random.randint(ks[7], (B, T), 1, V, dtype=jnp.int32)

    packed = jax.block_until_ready(pack_params(params))        # one-time packing

    out = jax.block_until_ready(hybrid_forward(tokens, packed))
    ref = jax.block_until_ready(reference_forward(tokens, params))
    assert out.shape == (B, C), out.shape
    assert jnp.allclose(out, ref, atol=1e-4, rtol=1e-4), "mismatch vs reference"
    print("KERNEL_OK")
</pallas_src>

<mosaic_0001>
module attributes {stable_mosaic.version = 11 : i64} {
  func.func @fused_kernel(%arg0: i32, %arg1: memref<32x1xi32, #tpu.memory_space<vmem>>, %arg2: memref<100x32xf32, #tpu.memory_space<vmem>>, %arg3: memref<3x32x32xf32, #tpu.memory_space<vmem>>, %arg4: memref<1x32xf32, #tpu.memory_space<vmem>>, %arg5: memref<32x32xf32, #tpu.memory_space<vmem>>, %arg6: memref<32x32xf32, #tpu.memory_space<vmem>>, %arg7: memref<1x32xf32, #tpu.memory_space<vmem>>, %arg8: memref<32x10xf32, #tpu.memory_space<vmem>>, %arg9: memref<1x10xf32, #tpu.memory_space<vmem>>, %arg10: memref<2x10xf32, #tpu.memory_space<vmem>>, %arg11: memref<2x18x32xf32, #tpu.memory_space<vmem>>) attributes {dimension_semantics = [#tpu.dimension_semantics<arbitrary>], iteration_bounds = array<i64: 1>, scalar_prefetch = 0 : i64, scratch_operands = 1 : i64, tpu.core_type = #tpu.core_type<tc>, window_params = [{pipeline_mode = #tpu.pipeline_mode<synchronous>, transform_indices = @transform_0, window_bounds = array<i64: 32, 1>}, {pipeline_mode = #tpu.pipeline_mode<synchronous>, transform_indices = @transform_1, window_bounds = array<i64: 100, 32>}, {pipeline_mode = #tpu.pipeline_mode<synchronous>, transform_indices = @transform_2, window_bounds = array<i64: 3, 32, 32>}, {pipeline_mode = #tpu.pipeline_mode<synchronous>, transform_indices = @transform_3, window_bounds = array<i64: 1, 32>}, {pipeline_mode = #tpu.pipeline_mode<synchronous>, transform_indices = @transform_4, window_bounds = array<i64: 32, 32>}, {pipeline_mode = #tpu.pipeline_mode<synchronous>, transform_indices = @transform_5, window_bounds = array<i64: 32, 32>}, {pipeline_mode = #tpu.pipeline_mode<synchronous>, transform_indices = @transform_6, window_bounds = array<i64: 1, 32>}, {pipeline_mode = #tpu.pipeline_mode<synchronous>, transform_indices = @transform_7, window_bounds = array<i64: 32, 10>}, {pipeline_mode = #tpu.pipeline_mode<synchronous>, transform_indices = @transform_8, window_bounds = array<i64: 1, 10>}, {pipeline_mode = #tpu.pipeline_mode<synchronous>, transform_indices = @transform_9, window_bounds = array<i64: 2, 10>}]} {
    %c0 = arith.constant 0 : index
    %c0_0 = arith.constant 0 : index
    %0 = vector.load %arg1[%c0, %c0_0] : memref<32x1xi32, #tpu.memory_space<vmem>>, vector<32x1xi32>
    %1 = tpu.iota {dimensions = array<i32: 1>} : vector<32x100xi32>
    %2 = vector.broadcast %0 : vector<32x1xi32> to vector<32x100xi32>
    %3 = arith.cmpi eq, %2, %1 : vector<32x100xi32>
    %4 = arith.extui %3 : vector<32x100xi1> to vector<32x100xi32>
    %5 = arith.sitofp %4 : vector<32x100xi32> to vector<32x100xf32>
    %c0_1 = arith.constant 0 : index
    %c0_2 = arith.constant 0 : index
    %6 = vector.load %arg2[%c0_1, %c0_2] : memref<100x32xf32, #tpu.memory_space<vmem>>, vector<100x32xf32>
    %cst = arith.constant dense<0.000000e+00> : vector<32x32xf32>
    %7 = tpu.matmul %5, %6, %cst {dimension_numbers = #tpu.dot_dimension_numbers<[1], [0], [0], [1], [0, 0, 1, 1], [], []>} : vector<32x100xf32>, vector<100x32xf32>, vector<32x32xf32> -> vector<32x32xf32>
    %8 = vector.shape_cast %7 : vector<32x32xf32> to vector<2x16x32xf32>
    %cst_3 = arith.constant 0.000000e+00 : f32
    %9 = vector.broadcast %cst_3 : f32 to vector<2x18x32xf32>
    %c0_4 = arith.constant 0 : index
    %c0_5 = arith.constant 0 : index
    %c0_6 = arith.constant 0 : index
    %10 = vector.load %arg11[%c0_4, %c0_5, %c0_6] : memref<2x18x32xf32, #tpu.memory_space<vmem>>, vector<2x18x32xf32>
    tpu.vector_store %arg11[%c0_4, %c0_5, %c0_6], %9 {strides = array<i32>} : memref<2x18x32xf32, #tpu.memory_space<vmem>>, vector<2x18x32xf32>,
    %c0_7 = arith.constant 0 : index
    %c1 = arith.constant 1 : index
    %c0_8 = arith.constant 0 : index
    %11 = vector.load %arg11[%c0_7, %c1, %c0_8] : memref<2x18x32xf32, #tpu.memory_space<vmem>>, vector<2x16x32xf32>
    tpu.vector_store %arg11[%c0_7, %c1, %c0_8], %8 {strides = array<i32>} : memref<2x18x32xf32, #tpu.memory_space<vmem>>, vector<2x16x32xf32>,
    %cst_9 = arith.constant 0.000000e+00 : f32
    %12 = vector.broadcast %cst_9 : f32 to vector<32x32xf32>
    %c0_10 = arith.constant 0 : index
    %c0_11 = arith.constant 0 : index
    %c0_12 = arith.constant 0 : index
    %13 = vector.load %arg11[%c0_10, %c0_11, %c0_12] : memref<2x18x32xf32, #tpu.memory_space<vmem>>, vector<2x16x32xf32>
    %14 = vector.shape_cast %13 : vector<2x16x32xf32> to vector<32x32xf32>
    %c0_13 = arith.constant 0 : index
    %c0_14 = arith.constant 0 : index
    %c0_15 = arith.constant 0 : index
    %15 = vector.load %arg3[%c0_13, %c0_14, %c0_15] : memref<3x32x32xf32, #tpu.memory_space<vmem>>, vector<1x32x32xf32>
    %16 = vector.shape_cast %15 : vector<1x32x32xf32> to vector<32x32xf32>
    %cst_16 = arith.constant dense<0.000000e+00> : vector<32x32xf32>
    %17 = tpu.matmul %14, %16, %cst_16 {dimension_numbers = #tpu.dot_dimension_numbers<[1], [0], [0], [1], [0, 0, 1, 1], [], []>} : vector<32x32xf32>, vector<32x32xf32>, vector<32x32xf32> -> vector<32x32xf32>
    %18 = arith.addf %12, %17 : vector<32x32xf32>
    %c0_17 = arith.constant 0 : index
    %c1_18 = arith.constant 1 : index
    %c0_19 = arith.constant 0 : index
    %19 = vector.load %arg11[%c0_17, %c1_18, %c0_19] : memref<2x18x32xf32, #tpu.memory_space<vmem>>, vector<2x16x32xf32>
    %20 = vector.shape_cast %19 : vector<2x16x32xf32> to vector<32x32xf32>
    %c1_20 = arith.constant 1 : index
    %c0_21 = arith.constant 0 : index
    %c0_22 = arith.constant 0 : index
    %21 = vector.load %arg3[%c1_20, %c0_21, %c0_22] : memref<3x32x32xf32, #tpu.memory_space<vmem>>, vector<1x32x32xf32>
    %22 = vector.shape_cast %21 : vector<1x32x32xf32> to vector<32x32xf32>
    %cst_23 = arith.constant dense<0.000000e+00> : vector<32x32xf32>
    %23 = tpu.matmul %20, %22, %cst_23 {dimension_numbers = #tpu.dot_dimension_numbers<[1], [0], [0], [1], [0, 0, 1, 1], [], []>} : vector<32x32xf32>, vector<32x32xf32>, vector<32x32xf32> -> vector<32x32xf32>
    %24 = arith.addf %18, %23 : vector<32x32xf32>
    %c0_24 = arith.constant 0 : index
    %c2 = arith.constant 2 : index
    %c0_25 = arith.constant 0 : index
    %25 = vector.load %arg11[%c0_24, %c2, %c0_25] : memref<2x18x32xf32, #tpu.memory_space<vmem>>, vector<2x16x32xf32>
    %26 = vector.shape_cast %25 : vector<2x16x32xf32> to vector<32x32xf32>
    %c2_26 = arith.constant 2 : index
    %c0_27 = arith.constant 0 : index
    %c0_28 = arith.constant 0 : index
    %27 = vector.load %arg3[%c2_26, %c0_27, %c0_28] : memref<3x32x32xf32, #tpu.memory_space<vmem>>, vector<1x32x32xf32>
    %28 = vector.shape_cast %27 : vector<1x32x32xf32> to vector<32x32xf32>
    %cst_29 = arith.constant dense<0.000000e+00> : vector<32x32xf32>
    %29 = tpu.matmul %26, %28, %cst_29 {dimension_numbers = #tpu.dot_dimension_numbers<[1], [0], [0], [1], [0, 0, 1, 1], [], []>} : vector<32x32xf32>, vector<32x32xf32>, vector<32x32xf32> -> vector<32x32xf32>
    %30 = arith.addf %24, %29 : vector<32x32xf32>
    %c0_30 = arith.constant 0 : index
    %c0_31 = arith.constant 0 : index
    %31 = vector.load %arg4[%c0_30, %c0_31] : memref<1x32xf32, #tpu.memory_space<vmem>>, vector<1x32xf32>
    %32 = vector.broadcast %31 : vector<1x32xf32> to vector<32x32xf32>
    %33 = arith.addf %30, %32 : vector<32x32xf32>
    %34 = vector.shape_cast %33 : vector<32x32xf32> to vector<2x16x32xf32>
    %cst_32 = arith.constant 0.000000e+00 : f32
    %35 = vector.broadcast %cst_32 : f32 to vector<2x16x32xf32>
    %36 = arith.maximumf %34, %35 : vector<2x16x32xf32>
    %cst_33 = arith.constant dense<0xFF800000> : vector<2x32xf32>
    %37 = vector.multi_reduction <maximumf>, %36, %cst_33 [1] : vector<2x16x32xf32> to vector<2x32xf32>
    %cst_34 = arith.constant 0.000000e+00 : f32
    %38 = vector.broadcast %cst_34 : f32 to vector<2x16x32xf32>
    %39 = arith.maximumf %8, %38 : vector<2x16x32xf32>
    %cst_35 = arith.constant dense<0xFF800000> : vector<2x32xf32>
    %40 = vector.multi_reduction <maximumf>, %39, %cst_35 [1] : vector<2x16x32xf32> to vector<2x32xf32>
    %c0_36 = arith.constant 0 : index
    %c0_37 = arith.constant 0 : index
    %41 = vector.load %arg5[%c0_36, %c0_37] : memref<32x32xf32, #tpu.memory_space<vmem>>, vector<32x32xf32>
    %cst_38 = arith.constant dense<0.000000e+00> : vector<2x32xf32>
    %42 = tpu.matmul %37, %41, %cst_38 {dimension_numbers = #tpu.dot_dimension_numbers<[1], [0], [0], [1], [0, 0, 1, 1], [], []>} : vector<2x32xf32>, vector<32x32xf32>, vector<2x32xf32> -> vector<2x32xf32>
    %c0_39 = arith.constant 0 : index
    %c0_40 = arith.constant 0 : index
    %43 = vector.load %arg6[%c0_39, %c0_40] : memref<32x32xf32, #tpu.memory_space<vmem>>, vector<32x32xf32>
    %cst_41 = arith.constant dense<0.000000e+00> : vector<2x32xf32>
    %44 = tpu.matmul %40, %43, %cst_41 {dimension_numbers = #tpu.dot_dimension_numbers<[1], [0], [0], [1], [0, 0, 1, 1], [], []>} : vector<2x32xf32>, vector<32x32xf32>, vector<2x32xf32> -> vector<2x32xf32>
    %45 = arith.addf %42, %44 : vector<2x32xf32>
    %c0_42 = arith.constant 0 : index
    %c0_43 = arith.constant 0 : index
    %46 = vector.load %arg7[%c0_42, %c0_43] : memref<1x32xf32, #tpu.memory_space<vmem>>, vector<1x32xf32>
    %47 = vector.broadcast %46 : vector<1x32xf32> to vector<2x32xf32>
    %48 = arith.addf %45, %47 : vector<2x32xf32>
    %cst_44 = arith.constant 0.000000e+00 : f32
    %49 = vector.broadcast %cst_44 : f32 to vector<2x32xf32>
    %50 = arith.maximumf %48, %49 : vector<2x32xf32>
    %c0_45 = arith.constant 0 : index
    %c0_46 = arith.constant 0 : index
    %51 = vector.load %arg8[%c0_45, %c0_46] : memref<32x10xf32, #tpu.memory_space<vmem>>, vector<32x10xf32>
    %cst_47 = arith.constant dense<0.000000e+00> : vector<2x10xf32>
    %52 = tpu.matmul %50, %51, %cst_47 {dimension_numbers = #tpu.dot_dimension_numbers<[1], [0], [0], [1], [0, 0, 1, 1], [], []>} : vector<2x32xf32>, vector<32x10xf32>, vector<2x10xf32> -> vector<2x10xf32>
    %c0_48 = arith.constant 0 : index
    %c0_49 = arith.constant 0 : index
    %53 = vector.load %arg9[%c0_48, %c0_49] : memref<1x10xf32, #tpu.memory_space<vmem>>, vector<1x10xf32>
    %54 = vector.broadcast %53 : vector<1x10xf32> to vector<2x10xf32>
    %55 = arith.addf %52, %54 : vector<2x10xf32>
    %c0_50 = arith.constant 0 : index
    %c0_51 = arith.constant 0 : index
    %56 = vector.load %arg10[%c0_50, %c0_51] : memref<2x10xf32, #tpu.memory_space<vmem>>, vector<2x10xf32>
    tpu.vector_store %arg10[%c0_50, %c0_51], %55 {strides = array<i32>} : memref<2x10xf32, #tpu.memory_space<vmem>>, vector<2x10xf32>,
    return
  }
  func.func @transform_0(%arg0: i32) -> (i32, i32) {
    %c0_i32 = arith.constant 0 : i32
    %c0_i32_0 = arith.constant 0 : i32
    %c0_i32_1 = arith.constant 0 : i32
    return %c0_i32, %c0_i32_0 : i32, i32
  }
  func.func @transform_1(%arg0: i32) -> (i32, i32) {
    %c0_i32 = arith.constant 0 : i32
    %c0_i32_0 = arith.constant 0 : i32
    %c0_i32_1 = arith.constant 0 : i32
    return %c0_i32, %c0_i32_0 : i32, i32
  }
  func.func @transform_2(%arg0: i32) -> (i32, i32, i32) {
    %c0_i32 = arith.constant 0 : i32
    %c0_i32_0 = arith.constant 0 : i32
    %c0_i32_1 = arith.constant 0 : i32
    %c0_i32_2 = arith.constant 0 : i32
    return %c0_i32, %c0_i32_0, %c0_i32_1 : i32, i32, i32
  }
  func.func @transform_3(%arg0: i32) -> (i32, i32) {
    %c0_i32 = arith.constant 0 : i32
    %c0_i32_0 = arith.constant 0 : i32
    %c0_i32_1 = arith.constant 0 : i32
    return %c0_i32, %c0_i32_0 : i32, i32
  }
  func.func @transform_4(%arg0: i32) -> (i32, i32) {
    %c0_i32 = arith.constant 0 : i32
    %c0_i32_0 = arith.constant 0 : i32
    %c0_i32_1 = arith.constant 0 : i32
    return %c0_i32, %c0_i32_0 : i32, i32
  }
  func.func @transform_5(%arg0: i32) -> (i32, i32) {
    %c0_i32 = arith.constant 0 : i32
    %c0_i32_0 = arith.constant 0 : i32
    %c0_i32_1 = arith.constant 0 : i32
    return %c0_i32, %c0_i32_0 : i32, i32
  }
  func.func @transform_6(%arg0: i32) -> (i32, i32) {
    %c0_i32 = arith.constant 0 : i32
    %c0_i32_0 = arith.constant 0 : i32
    %c0_i32_1 = arith.constant 0 : i32
    return %c0_i32, %c0_i32_0 : i32, i32
  }
  func.func @transform_7(%arg0: i32) -> (i32, i32) {
    %c0_i32 = arith.constant 0 : i32
    %c0_i32_0 = arith.constant 0 : i32
    %c0_i32_1 = arith.constant 0 : i32
    return %c0_i32, %c0_i32_0 : i32, i32
  }
  func.func @transform_8(%arg0: i32) -> (i32, i32) {
    %c0_i32 = arith.constant 0 : i32
    %c0_i32_0 = arith.constant 0 : i32
    %c0_i32_1 = arith.constant 0 : i32
    return %c0_i32, %c0_i32_0 : i32, i32
  }
  func.func @transform_9(%arg0: i32) -> (i32, i32) {
    %c0_i32 = arith.constant 0 : i32
    %c0_i32_0 = arith.constant 0 : i32
    %c0_i32_1 = arith.constant 0 : i32
    return %c0_i32, %c0_i32_0 : i32, i32
  }
}

</mosaic_0001>

<bundles_post_ra>
// kernel: hybrid_forward.1
= control target key start
LH: loop header
LB: loop body
LE: loop exit
PB: predicated region body
PF: predicated region fallthrough
CT: control target
= control target key end

     0   :  { %vm89_vm0 = vcmask 1043456   ;;  %v1060_v2 = vmov 0   ;;  %s1310_s0 = inlined_call_operand.vmem [shape: s32[32,1], index: 0, kind: input, shape index: {}]   ;;  %s1311_s1 = inlined_call_operand.vmem [shape: f32[100,32], index: 1, kind: input, shape index: {}]   ;;  %s1312_s2 = inlined_call_operand.vmem [shape: f32[3,32,32], index: 2, kind: input, shape index: {}]   ;;  %s1313_s3 = inlined_call_operand.vmem [shape: f32[1,32], index: 3, kind: input, shape index: {}]   ;;  %s1314_s4 = inlined_call_operand.vmem [shape: f32[32,32], index: 4, kind: input, shape index: {}]   ;;  %s1315_s5 = inlined_call_operand.vmem [shape: f32[32,32], index: 5, kind: input, shape index: {}]   ;;  %s1316_s6 = inlined_call_operand.vmem [shape: f32[1,32], index: 6, kind: input, shape index: {}]   ;;  %s1317_s7 = inlined_call_operand.vmem [shape: f32[32,10], index: 7, kind: input, shape index: {}]   ;;  %s1318_s8 = inlined_call_operand.vmem [shape: f32[1,10], index: 8, kind: input, shape index: {}]   ;;  %s1319_s9 = inlined_call_operand.hbm [shape: f32[2,10], index: 9, kind: output, shape index: {}]  }
   0x1   :  { %v35_v0 = vld [vmem:[%s1310_s0 + $0x10] sm:$0xff]  ;;  %v33_v1 = vld [vmem:[%s1310_s0] sm:$0xff]  ;;  %1037 = vset.pattern.permute.xlu1 %v1060_v2  ;;  %1036 = vset.pattern.permute.xlu0 %v1060_v2  ;;  %v74_v4 = vld [vmem:[%s1311_s1 + $0x58] sm:$0xff] }
   0x2   :  { %v75_v3 = vld [vmem:[%s1311_s1 + $0x60] sm:$0xf]  ;;  %46 = vperm.xlu1 %1037, %v35_v0   ;;  %40 = vperm.xlu0 %1036, %v33_v1   ;;  %v36_v5 = vld [vmem:[%s1310_s0 + $0x18] sm:$0xff]  ;;  %v34_v6 = vld [vmem:[%s1310_s0 + $0x8] sm:$0xff] }
   0x3   :  { %925 = vmatprep.subr.msk.mxu0 %vm89_vm0, %v75_v3  ;;  %v73_v7 = vld [vmem:[%s1311_s1 + $0x50] sm:$0xff] }
   0x4   :  { %926 = vmatpush3.msk.msra.mxu0 %vm89_vm0, %v75_v3 }
   0x5   :  { %927 = vmatprep.subr.mxu0 %v74_v4 }
   0x6   :  { %14 = vsyncpa [#allocation4], 0  ;;  %49 = vperm.xlu1 %1037, %v36_v5   ;;  %43 = vperm.xlu0 %1036, %v34_v6   ;;  %v72_v8 = vld [vmem:[%s1311_s1 + $0x48] sm:$0xff]  ;;  %v71_v9 = vld [vmem:[%s1311_s1 + $0x40] sm:$0xff]  ;;  %v1061_v18 = vmov 0.0   ;;  %v37_v19 = vlaneseq  ;;  %vm76_vm1 = vcmask 818176  }
   0x7   :  { %928 = vmatpush3.msra.mxu0 %v74_v4  ;;  %v70_v10 = vld [vmem:[%s1311_s1 + $0x38] sm:$0xff]  ;;  %v69_v11 = vld [vmem:[%s1311_s1 + $0x30] sm:$0xff]  ;;  %v68_v12 = vld [vmem:[%s1311_s1 + $0x28] sm:$0xff]  ;;  %vm178_vm6 = vcmask 261120   ;;  %vm181_vm7 = vcmask 254976   ;;  %vm1062_vm8 = vmmov 0  }
   0x8   :  { %929 = vmatprep.subr.mxu0 %v73_v7  ;;  %v67_v13 = vld [vmem:[%s1311_s1 + $0x20] sm:$0xff]  ;;  %v66_v14 = vld [vmem:[%s1311_s1 + $0x18] sm:$0xff]  ;;  %v65_v15 = vld [vmem:[%s1311_s1 + $0x10] sm:$0xff]  ;;  %v38_v20 = vand.u32 127, %v37_v19  ;;  %180 = vst.msk [vmem:[#allocation2 + $0x8] sm:$0xff] %vm178_vm6, %v1061_v18  ;;  %vm576_vm9 = vcmask 1041409  }
   0x9   :  { %930 = vmatpush3.msra.mxu0 %v73_v7  ;;  %v64_v16 = vld [vmem:[%s1311_s1 + $0x8] sm:$0xff]  ;;  %v63_v17 = vld [vmem:[%s1311_s1] sm:$0xff]  ;;  %182 = vst.msk [vmem:[#allocation2 + $0x10] sm:$0x3] %vm181_vm7, %v1061_v18  ;;  %185 = vst.msk [vmem:[#allocation2 + $0x28] sm:$0x3] %vm181_vm7, %v1061_v18 }
   0xa   :  { %931 = vmatprep.subr.mxu0 %v72_v8  ;;  %179 = vst.msk [vmem:[#allocation2] sm:$0xff] %vm178_vm6, %v1061_v18  ;;  %183 = vst.msk [vmem:[#allocation2 + $0x18] sm:$0xff] %vm178_vm6, %v1061_v18  ;;  %v846_v29 = vld [vmem:[%s1312_s2 + $0x38] sm:$0xff]  ;;  %v845_v30 = vld [vmem:[%s1312_s2 + $0x30] sm:$0xff]  ;;  %s1063_s23 = smov [#allocation3]   ;;  %vm818_vm10 = vcmask 74752  }
   0xb   :  { %932 = vmatpush3.msra.mxu0 %v72_v8  ;;  %184 = vst.msk [vmem:[#allocation2 + $0x20] sm:$0xff] %vm178_vm6, %v1061_v18  ;;  %957 = vmatprep.subr.mxu1 %v846_v29  ;;  %v844_v31 = vld [vmem:[%s1312_s2 + $0x28] sm:$0xff]  ;;  %v843_v32 = vld [vmem:[%s1312_s2 + $0x20] sm:$0xff]  ;;  %v197_v33 = vld [vmem:[%s1312_s2 + $0x18] sm:$0xff] }
   0xc   :  { %933 = vmatprep.subr.mxu0 %v71_v9  ;;  %958 = vmatpush3.msra.mxu1 %v846_v29  ;;  %v196_v50 = vld [vmem:[%s1312_s2 + $0x10] sm:$0xff]  ;;  %v195_v53 = vld [vmem:[%s1312_s2 + $0x8] sm:$0xff]  ;;  %v194_v57 = vld [vmem:[%s1312_s2] sm:$0xff] }
   0xd   :  { %934 = vmatpush3.msra.mxu0 %v71_v9  ;;  %959 = vmatprep.subr.mxu1 %v845_v30  ;;  %v858_v60 = vld [vmem:[%s1312_s2 + $0x58] sm:$0xff]  ;;  %v857_v63 = vld [vmem:[%s1312_s2 + $0x50] sm:$0xff]  ;;  %v856_v2 = vld [vmem:[%s1312_s2 + $0x48] sm:$0xff] }
   0xe   :  { %935 = vmatprep.subr.mxu0 %v70_v10  ;;  %960 = vmatpush3.msra.mxu1 %v845_v30  ;;  %v855_v5 = vld [vmem:[%s1312_s2 + $0x40] sm:$0xff]  ;;  %v573_v8 = vld [vmem:[%s1315_s5 + $0x18] sm:$0xff] }
   0xf   :  { %936 = vmatpush3.msra.mxu0 %v70_v10  ;;  %961 = vmatprep.subr.mxu1 %v844_v31 }
  0x10   :  { %937 = vmatprep.subr.mxu0 %v69_v11  ;;  %962 = vmatpush3.msra.mxu1 %v844_v31 }
  0x11   :  { %938 = vmatpush3.msra.mxu0 %v69_v11  ;;  %963 = vmatprep.subr.mxu1 %v843_v32 }
  0x12   :  { %939 = vmatprep.subr.mxu0 %v68_v12  ;;  %964 = vmatpush3.msra.mxu1 %v843_v32 }
  0x13   :  { %940 = vmatpush3.msra.mxu0 %v68_v12  ;;  %971 = vmatprep.subr.mxu1 %v197_v33  ;;  %v572_v12 = vld [vmem:[%s1315_s5 + $0x10] sm:$0xff] }
  0x14   :  { %941 = vmatprep.subr.mxu0 %v67_v13 }
  0x15   :  { %942 = vmatpush3.msra.mxu0 %v67_v13 }
  0x16   :  { %943 = vmatprep.subr.mxu0 %v66_v14 }
  0x17   :  { %944 = vmatpush3.msra.mxu0 %v66_v14  ;;  %v571_v14 = vld [vmem:[%s1315_s5 + $0x8] sm:$0xff] }
  0x18   :  { %945 = vmatprep.subr.mxu0 %v65_v15 }
  0x19   :  { %946 = vmatpush3.msra.mxu0 %v65_v15 }
  0x1a   :  { %947 = vmatprep.subr.mxu0 %v64_v16 }
  0x1b   :  { %948 = vmatpush3.msra.mxu0 %v64_v16 }
  0x1c   :  { %949 = vmatprep.subr.mxu0 %v63_v17 }
  0x1d   :  { %950 = vmatpush3.msra.mxu0 %v63_v17  ;;  %v570_v17 = vld [vmem:[%s1315_s5] sm:$0xff] }
  0x1e   :  { %1010 = vmatprep.subr.mxu0 %v1061_v18 }
  0x7d   :  { %v47_v21 = vpop.permute.xlu1 %46  ;;  %v41_v22 = vpop.permute.xlu0 %40 }
  0x7e   :  { %vm51_vm2 = vcmp.eq.s32.totalorder %v41_v22, %v38_v20  ;;  %vm53_vm3 = vcmp.eq.s32.totalorder %v47_v21, %v38_v20  ;;  %v569_v21 = vld [vmem:[%s1314_s4 + $0x18] sm:$0xff]  ;;  %v568_v22 = vld [vmem:[%s1314_s4 + $0x10] sm:$0xff] }
  0x7f   :  { %v834_v23 = vsel %vm51_vm2, 1.0, %v1061_v18  ;;  %v836_v26 = vsel %vm53_vm3, 1.0, %v1061_v18 }
  0x80   :  { %951 = vmatprep.mubr.msk.f32.mxu0 %vm76_vm1, %v834_v23  ;;  %v567_v23 = vld [vmem:[%s1314_s4 + $0x8] sm:$0xff] }
  0x81   :  { %v50_v24 = vpop.permute.xlu1 %49  ;;  %v44_v25 = vpop.permute.xlu0 %43 }
  0x82   :  { %vm52_vm4 = vcmp.eq.s32.totalorder %v44_v25, %v38_v20  ;;  %vm54_vm5 = vcmp.eq.s32.totalorder %v50_v24, %v38_v20  ;;  %v566_v24 = vld [vmem:[%s1314_s4] sm:$0xff] }
  0x83   :  { %v835_v27 = vsel %vm52_vm4, 1.0, %v1061_v18  ;;  %v837_v28 = vsel %vm54_vm5, 1.0, %v1061_v18 }
  0x84   :  { %952 = vmatmul.mubr.msk.f32.vlgmr.msra.gmra.mxu0 %vm76_vm1, %v835_v27 }
  0x85   :  { %954 = vmatprep.mubr.msk.f32.mxu0 %vm76_vm1, %v836_v26  ;;  %1011 = vmatpush3.msra.mxu0 %v569_v21 }
  0x86   :  { %1012 = vmatprep.subr.mxu0 %v1061_v18 }
  0x87   :  { %1013 = vmatpush3.msra.mxu0 %v568_v22  ;;  %v867_v22 = vld [vmem:[%s1318_s8] ss:$0 sm:$0xff] }
  0x88   :  { %955 = vmatmul.mubr.msk.f32.gmra.mxu0 %vm76_vm1, %v837_v28  ;;  %1014 = vmatprep.subr.mxu0 %v1061_v18 }
  0x89   :  { %1018 = vmatprep.mubr.msk.f32.mxu0 %vm1062_vm8, %v1061_v18  ;;  %1015 = vmatpush3.msra.mxu0 %v567_v23 }
  0x8a   :  { %1016 = vmatprep.subr.mxu0 %v1061_v18 }
  0x8b   :  { %1017 = vmatpush3.msra.mxu0 %v566_v24 }
 0x144   :  { %v953_v34 = vpop.f32.mrf.mxu0 }
 0x145   :  { %187 = vst.msk [vmem:[#allocation2 + $0x9] sm:$0xff] %vm178_vm6, %v953_v34  ;;  %v545_v37 = vmax.f32 %v953_v34, 0.0 }
 0x146   :  { %v159_v35 = vpop.f32.mrf.mxu0 }
 0x147   :  { %186 = vst.msk [vmem:[#allocation2 + $0x1] sm:$0xff] %vm178_vm6, %v159_v35  ;;  %v544_v36 = vmax.f32 %v159_v35, 0.0  ;;  %v549_v43 = vsel %vm178_vm6, %v545_v37, -inf  ;;  %v863_v35 = vld [vmem:[%s1313_s3] ss:$0 sm:$0xff] }
 0x148   :  { %v956_v38 = vpop.f32.mrf.mxu0 }
 0x149   :  { %189 = vst.msk [vmem:[#allocation2 + $0x21] sm:$0xff] %vm178_vm6, %v956_v38  ;;  %v547_v39 = vmax.f32 %v956_v38, 0.0  ;;  %v548_v40 = vsel %vm178_vm6, %v544_v36, -inf }
 0x14a   :  { %v169_v41 = vpop.f32.mrf.mxu0  ;;  %v550_v44 = vmax.f32 %v548_v40, %v549_v43 }
 0x14b   :  { %188 = vst.msk [vmem:[#allocation2 + $0x19] sm:$0xff] %vm178_vm6, %v169_v41  ;;  %v546_v42 = vmax.f32 %v169_v41, 0.0  ;;  %v558_v45 = vsel %vm178_vm6, %v547_v39, -inf }
 0x14c   :  { %v199_v49 = vld [vmem:[#allocation2 + $0x9] sm:$0xff]  ;;  %v551_v52 = vrot.slane %v550_v44, 4 }
 0x14d   :  { %v557_v46 = vsel %vm178_vm6, %v546_v42, -inf  ;;  %v402_v10 = vld [vmem:[#allocation2 + $0xa] sm:$0xff] }
 0x14e   :  { %v559_v47 = vmax.f32 %v557_v46, %v558_v45  ;;  %v198_v48 = vld [vmem:[#allocation2 + $0x1] sm:$0xff]  ;;  %v552_v59 = vmax.f32 %v550_v44, %v551_v52 }
 0x14f   :  { %965 = vmatprep.mubr.msk.f32.mxu1 %vm178_vm6, %v198_v48  ;;  %v190_v58 = vld [vmem:[#allocation2] sm:$0xff]  ;;  %v191_v62 = vld [vmem:[#allocation2 + $0x8] sm:$0xff] }
 0x150   :  { %v560_v51 = vrot.slane %v559_v47, 4  ;;  %966 = vmatmul.mubr.msk.f32.vlgmr.msra.gmra.mxu1 %vm178_vm6, %v199_v49  ;;  %v201_v56 = vld [vmem:[#allocation2 + $0x21] sm:$0xff]  ;;  %v553_v1 = vrot.slane %v552_v59, 2 }
 0x151   :  { %972 = vmatpush3.msra.mxu1 %v197_v33  ;;  %v401_v6 = vld [vmem:[#allocation2 + $0x2] sm:$0xff] }
 0x152   :  { %973 = vmatprep.subr.mxu1 %v196_v50  ;;  %v200_v54 = vld [vmem:[#allocation2 + $0x19] sm:$0xff]  ;;  %v561_v55 = vmax.f32 %v559_v47, %v560_v51  ;;  %v554_v7 = vmax.f32 %v552_v59, %v553_v1  ;;  %v404_v16 = vld [vmem:[#allocation2 + $0x22] sm:$0xff] }
 0x153   :  { %974 = vmatpush3.msra.mxu1 %v196_v50  ;;  %968 = vmatprep.mubr.msk.f32.mxu1 %vm178_vm6, %v200_v54  ;;  %v192_v0 = vld [vmem:[#allocation2 + $0x18] sm:$0xff]  ;;  %v193_v4 = vld [vmem:[#allocation2 + $0x20] sm:$0xff] }
 0x154   :  { %975 = vmatprep.subr.mxu1 %v195_v53  ;;  %969 = vmatmul.mubr.msk.f32.gmra.mxu1 %vm178_vm6, %v201_v56  ;;  %v562_v61 = vrot.slane %v561_v55, 2  ;;  %v403_v11 = vld [vmem:[#allocation2 + $0x1a] sm:$0xff]  ;;  %v555_v13 = vrot.slane %v554_v7, 1 }
 0x155   :  { %976 = vmatpush3.msra.mxu1 %v195_v53  ;;  %979 = vmatprep.mubr.msk.f32.mxu1 %vm178_vm6, %v190_v58 }
 0x156   :  { %977 = vmatprep.subr.mxu1 %v194_v57  ;;  %v563_v3 = vmax.f32 %v561_v55, %v562_v61  ;;  %v556_v19 = vmax.f32 %v554_v7, %v555_v13  ;;  %v735_v13 = vld [vmem:[%s1317_s7 + $0x8] sm:$0xff] }
 0x157   :  { %978 = vmatpush3.msra.mxu1 %v194_v57 }
 0x158   :  { %985 = vmatprep.subr.mxu1 %v858_v60  ;;  %980 = vmatmul.mubr.msk.f32.vlgmr.msra.gmra.mxu1 %vm178_vm6, %v191_v62  ;;  %v564_v9 = vrot.slane %v563_v3, 1 }
 0x159   :  { %986 = vmatpush3.msra.mxu1 %v858_v60  ;;  %982 = vmatprep.mubr.msk.f32.mxu1 %vm178_vm6, %v192_v0 }
 0x15a   :  { %987 = vmatprep.subr.mxu1 %v857_v63  ;;  %v565_v15 = vmax.f32 %v563_v3, %v564_v9 }
 0x15b   :  { %988 = vmatpush3.msra.mxu1 %v857_v63 }
 0x15c   :  { %989 = vmatprep.subr.mxu1 %v856_v2  ;;  %983 = vmatmul.mubr.msk.f32.gmra.mxu1 %vm178_vm6, %v193_v4  ;;  %v577_v20 = vsel %vm576_vm9, %v565_v15, %v556_v19 }
 0x15d   :  { %990 = vmatpush3.msra.mxu1 %v856_v2  ;;  %993 = vmatprep.mubr.msk.f32.mxu1 %vm178_vm6, %v401_v6 }
 0x15e   :  { %991 = vmatprep.subr.mxu1 %v855_v5 }
 0x15f   :  { %992 = vmatpush3.msra.mxu1 %v855_v5 }
 0x160   :  { %994 = vmatmul.mubr.msk.f32.vlgmr.msra.gmra.mxu1 %vm178_vm6, %v402_v10  ;;  %999 = vmatprep.subr.mxu1 %v1061_v18 }
 0x161   :  { %996 = vmatprep.mubr.msk.f32.mxu1 %vm178_vm6, %v403_v11  ;;  %1000 = vmatpush3.msra.mxu1 %v573_v8  ;;  %v737_v11 = vld [vmem:[%s1317_s7 + $0x18] sm:$0xff] }
 0x162   :  { %1001 = vmatprep.subr.mxu1 %v1061_v18 }
 0x163   :  { %1002 = vmatpush3.msra.mxu1 %v572_v12  ;;  %v736_v12 = vld [vmem:[%s1317_s7 + $0x10] sm:$0xff] }
 0x164   :  { %997 = vmatmul.mubr.msk.f32.gmra.mxu1 %vm178_vm6, %v404_v16  ;;  %1003 = vmatprep.subr.mxu1 %v1061_v18  ;;  %v866_v16 = vld [vmem:[%s1316_s6] ss:$0 sm:$0xff] }
 0x165   :  { %1004 = vmatpush3.msra.mxu1 %v571_v14  ;;  %1007 = vmatprep.mubr.msk.f32.mxu1 %vm1062_vm8, %v1061_v18  ;;  %v734_v14 = vld [vmem:[%s1317_s7] sm:$0xff]  ;;  %s826_s7 = sshll.u32 %s1063_s23, 4  ;;  %s827_s7 = int_to_ptr.vmem [resolvable:$true] %s826_s7 }
 0x166   :  { %1005 = vmatprep.subr.mxu1 %v1061_v18  ;;  %s1038_s24 = scalar_lea.vmem %s827_s7, 32  ;;  %p1043_p1 = scmp.lt.s32.totalorder %s827_s7, %s827_s7 }
 0x167   :  { %1006 = vmatpush3.msra.mxu1 %v570_v17  ;;  %p1039_p0 = scmp.ne.s32.totalorder %s827_s7, %s1038_s24  ;;  %p1044_p2 = scmp.lt.s32.totalorder %s1038_s24, %s1038_s24 }
 0x168   :  { %1008 = vmatmul.mubr.msk.f32.vlgmr.msra.gmra.mxu1 %vm178_vm6, %v577_v20  ;;  %1021 = vmatprep.subr.mxu1 %v1061_v18 }
 0x169   :  { %1029 = vmatprep.mubr.msk.f32.mxu1 %vm1062_vm8, %v1061_v18  ;;  %1022 = vmatpush3.msra.mxu1 %v737_v11  ;;  %p1045_p3 = por %p1044_p2, %p1043_p1 }
 0x16a   :  { %1023 = vmatprep.subr.mxu1 %v1061_v18 }
 0x16b   :  { %1024 = vmatpush3.msra.mxu1 %v736_v12  ;;  %p1046_p4 = pnand %p1045_p3, %p1039_p0 }
 0x16c   :  { %1025 = vmatprep.subr.mxu1 %v1061_v18 }
 0x16d   :  { %1026 = vmatpush3.msra.mxu1 %v735_v13 }
 0x16e   :  { %1027 = vmatprep.subr.mxu1 %v1061_v18 }
 0x16f   :  { %1028 = vmatpush3.msra.mxu1 %v734_v14 }
 0x210   :  { %v967_v25 = vpop.f32.mrf.mxu1 }
 0x212   :  { %v285_v26 = vpop.f32.mrf.mxu1 }
 0x214   :  { %v970_v27 = vpop.f32.mrf.mxu1 }
 0x216   :  { %v295_v28 = vpop.f32.mrf.mxu1 }
 0x218   :  { %v981_v29 = vpop.f32.mrf.mxu1 }
 0x219   :  { %v388_v33 = vadd.f32 %v981_v29, %v967_v25 }
 0x21a   :  { %v382_v30 = vpop.f32.mrf.mxu1 }
 0x21b   :  { %v383_v36 = vadd.f32 %v382_v30, %v285_v26 }
 0x21c   :  { %v984_v31 = vpop.f32.mrf.mxu1 }
 0x21d   :  { %v398_v39 = vadd.f32 %v984_v31, %v970_v27 }
 0x21e   :  { %v392_v32 = vpop.f32.mrf.mxu1 }
 0x21f   :  { %v393_v43 = vadd.f32 %v392_v32, %v295_v28 }
 0x220   :  { %v995_v34 = vpop.f32.mrf.mxu1 }
 0x221   :  { %v508_v37 = vadd.f32 %v995_v34, %v388_v33 }
 0x222   :  { %v488_v38 = vpop.f32.mrf.mxu1 }
 0x223   :  { %v519_v40 = vadd.f32 %v863_v35, %v508_v37  ;;  %v507_v41 = vadd.f32 %v488_v38, %v383_v36 }
 0x224   :  { %v998_v42 = vpop.f32.mrf.mxu1 }
 0x225   :  { %v523_v44 = vmax.f32 %v519_v40, 0.0  ;;  %v518_v45 = vadd.f32 %v863_v35, %v507_v41  ;;  %v510_v46 = vadd.f32 %v998_v42, %v398_v39 }
 0x226   :  { %v498_v47 = vpop.f32.mrf.mxu1 }
 0x227   :  { %v522_v48 = vmax.f32 %v518_v45, 0.0  ;;  %v521_v49 = vadd.f32 %v863_v35, %v510_v46  ;;  %v509_v50 = vadd.f32 %v498_v47, %v393_v43  ;;  %v527_v52 = vsel %vm178_vm6, %v523_v44, -inf }
 0x228   :  { %v646_v51 = vpop.f32.mrf.mxu1 }
 0x229   :  { %v526_v53 = vsel %vm178_vm6, %v522_v48, -inf  ;;  %v525_v54 = vmax.f32 %v521_v49, 0.0  ;;  %v520_v55 = vadd.f32 %v863_v35, %v509_v50 }
 0x22a   :  { %v528_v56 = vmax.f32 %v526_v53, %v527_v52  ;;  %v1009_v57 = vpop.f32.mrf.mxu1 }
 0x22b   :  { %v524_v58 = vmax.f32 %v520_v55, 0.0  ;;  %v536_v60 = vsel %vm178_vm6, %v525_v54, -inf }
 0x22c   :  { %v529_v59 = vrot.slane %v528_v56, 4 }
 0x22d   :  { %v535_v61 = vsel %vm178_vm6, %v524_v58, -inf }
 0x22e   :  { %v530_v62 = vmax.f32 %v528_v56, %v529_v59  ;;  %v537_v63 = vmax.f32 %v535_v61, %v536_v60 }
 0x230   :  { %v531_v0 = vrot.slane %v530_v62, 2  ;;  %v538_v1 = vrot.slane %v537_v63, 4 }
 0x232   :  { %v532_v2 = vmax.f32 %v530_v62, %v531_v0  ;;  %v539_v3 = vmax.f32 %v537_v63, %v538_v1 }
 0x234   :  { %v540_v4 = vrot.slane %v539_v3, 2  ;;  %v533_v5 = vrot.slane %v532_v2, 1 }
 0x236   :  { %v541_v6 = vmax.f32 %v539_v3, %v540_v4  ;;  %v534_v8 = vmax.f32 %v532_v2, %v533_v5 }
 0x238   :  { %v542_v7 = vrot.slane %v541_v6, 1 }
 0x23a   :  { %v543_v9 = vmax.f32 %v541_v6, %v542_v7 }
 0x23c   :  { %v652_v10 = vsel %vm576_vm9, %v543_v9, %v534_v8 }
 0x23d   :  { %1019 = vmatmul.mubr.msk.f32.vlgmr.msra.gmra.mxu0 %vm178_vm6, %v652_v10 }
 0x2fd   :  { %v721_v15 = vpop.f32.mrf.mxu0 }
 0x2fe   :  { %v722_v17 = vadd.f32 %v721_v15, %v646_v51 }
 0x2ff   :  { %v1020_v19 = vpop.f32.mrf.mxu0 }
 0x300   :  { %v732_v20 = vadd.f32 %v866_v16, %v722_v17 }
 0x302   :  { %v733_v21 = vmax.f32 %v732_v20, 0.0 }
 0x304   :  { %1030 = vmatmul.mubr.msk.f32.vlgmr.msra.gmra.mxu1 %vm178_vm6, %v733_v21 }
 0x3c4   :  { %v814_v23 = vpop.f32.mrf.mxu1 }
 0x3c5   :  { %v815_v18 = vadd.f32 %v867_v22, %v814_v23 }
 0x3c6   :  { %v1031_v24 = vpop.f32.mrf.mxu1 }
 0x3c7   :  { %819 = vst.msk [vmem:[#allocation3] sm:$0x3] %vm818_vm10, %v815_v18 }
 0x3c8   :  { %1049 = shalt.err (!%p1046_p4)
}
 0x3c9   :  { %829 = dma.vmem_to_hbm [thread:$0]  %s827_s7, 32, %s1319_s9, [#allocation4]  }
 0x3ca   :  { %1058 = dma.done.wait [#allocation4], 32  }
 0x3cb   :  { %1059 = vsyncadd [#allocation4], 4294967264 }
 0x3cc   :  { %833 = vsyncpa [#allocation4], 1 }

</bundles_post_ra>
